<compile_context>
chip_gen: v7x
topology: tpu7x:2x2x1
jax: 0.10.0
libtpu: 0.0.40
codegen_flags: <defaults>
</compile_context>

<pallas_src>
import jax
import jax.numpy as jnp
from jax.experimental import pallas as pl
from jax.experimental.pallas import tpu as pltpu

IN_DIM = 784
HID_DIM = 128
OUT_DIM = 10

OUT_PAD = 128    # lane-dense logits / output tile
NEG_BIG = -1e30  # padded-class bias -> exp underflows to exactly 0


def _round_up(n, m):
    return (n + m - 1) // m * m


def mlp_kernel(x_ref, w1_ref, b1_ref, w2_ref, b2_ref, o_ref):
    # fc1 + ReLU (MXU matmul, f32 accumulate).
    h = jnp.dot(x_ref[...], w1_ref[...], preferred_element_type=jnp.float32)
    h = jnp.maximum(h + b1_ref[...], 0.0)              # (TB,128) + (1,128)
    # fc2 on the 128-wide padded output tile.
    logits = jnp.dot(h, w2_ref[...], preferred_element_type=jnp.float32)
    logits = logits + b2_ref[...]                      # padded cols -> ~ -1e30
    # Max-stabilized softmax over the lane-dense 128-wide tile
    # (PyTorch nn.Softmax() on 2D input -> dim=1). Padded cols contribute 0.
    m = jnp.max(logits, axis=-1, keepdims=True)
    e = jnp.exp(logits - m)
    denom = jnp.sum(e, axis=-1, keepdims=True)
    inv = pl.reciprocal(denom, approx=False)           # exact: keep tolerance parity
    o_ref[...] = (e * inv).astype(o_ref.dtype)


def my_mlp_forward(x, w1_t, b1, w2_t, b2, *, tb=1024):
    """x: (B, 784) f32; w1_t: (784,128); b1: (1,128); w2_t: (128,10); b2: (1,10)."""
    B = x.shape[0]
    # Batch tile: multiple of 8, <= tb, and <= ~half the batch so large batches
    # give grid >= 2 ("parallel" axis can shard across 2 TensorCores on v7x).
    tb_eff = max(8, min(tb, _round_up(pl.cdiv(B, 2), 8)))
    grid = (pl.cdiv(B, tb_eff),)   # partial last block: OOB rows undefined, never used

    # Only fc2 is padded to a lane-dense 128 columns; padded bias = -1e30 so the
    # padded classes get exactly-zero softmax probability. x / w1 / b1 unpadded.
    w2_p = jnp.zeros((HID_DIM, OUT_PAD), jnp.float32).at[:, :OUT_DIM].set(w2_t)
    b2_p = jnp.full((1, OUT_PAD), NEG_BIG, jnp.float32).at[:, :OUT_DIM].set(b2)

    flops = 2 * B * (IN_DIM * HID_DIM + HID_DIM * OUT_PAD)
    bytes_accessed = 4 * (B * IN_DIM + IN_DIM * HID_DIM + HID_DIM
                          + HID_DIM * OUT_PAD + OUT_PAD + B * OUT_PAD)

    out_padded = pl.pallas_call(
        mlp_kernel,
        out_shape=jax.ShapeDtypeStruct((B, OUT_PAD), jnp.float32),
        grid=grid,
        in_specs=[
            # x streams per batch tile (double-buffered by the pipeline);
            # last block dim == full array dim (784), so no 128-divisibility issue.
            pl.BlockSpec((tb_eff, IN_DIM), lambda i: (i, 0)),
            # Weights / biases: same block every iteration -> resident in VMEM.
            pl.BlockSpec((IN_DIM, HID_DIM), lambda i: (0, 0)),
            pl.BlockSpec((1, HID_DIM), lambda i: (0, 0)),
            pl.BlockSpec((HID_DIM, OUT_PAD), lambda i: (0, 0)),
            pl.BlockSpec((1, OUT_PAD), lambda i: (0, 0)),
        ],
        out_specs=pl.BlockSpec((tb_eff, OUT_PAD), lambda i: (i, 0)),
        compiler_params=pltpu.CompilerParams(
            dimension_semantics=("parallel",),  # independent batch tiles; 2 TCs on v7x
        ),
        cost_estimate=pl.CostEstimate(
            flops=flops,
            transcendentals=B * OUT_PAD,
            bytes_accessed=bytes_accessed,
        ),
    )(x, w1_t, b1, w2_p, b2_p)

    # Drop the padded (zero-probability) classes; rows need no slicing.
    return out_padded[:, :OUT_DIM]


def reference_forward(x, w1_t, b1, w2_t, b2):
    # High-precision f32 reference (per review: validate against precision=HIGHEST).
    h = jnp.maximum(jnp.dot(x, w1_t, precision=jax.lax.Precision.HIGHEST) + b1, 0.0)
    logits = jnp.dot(h, w2_t, precision=jax.lax.Precision.HIGHEST) + b2
    return jax.nn.softmax(logits, axis=-1)


if __name__ == "__main__":
    key = jax.random.PRNGKey(0)
    k_x, k_w1, k_b1, k_w2, k_b2 = jax.random.split(key, 5)

    B = 8
    x = jax.random.normal(k_x, (B, IN_DIM), dtype=jnp.float32)

    # Deterministic params (PyTorch Linear weight is (out,in); store transposed (in,out)).
    bound1 = 1.0 / (IN_DIM ** 0.5)
    w1_t = jax.random.uniform(k_w1, (IN_DIM, HID_DIM), jnp.float32, -bound1, bound1)
    b1 = jax.random.uniform(k_b1, (1, HID_DIM), jnp.float32, -bound1, bound1)

    bound2 = 1.0 / (HID_DIM ** 0.5)
    w2_t = jax.random.uniform(k_w2, (HID_DIM, OUT_DIM), jnp.float32, -bound2, bound2)
    b2 = jax.random.uniform(k_b2, (1, OUT_DIM), jnp.float32, -bound2, bound2)

    out = my_mlp_forward(x, w1_t, b1, w2_t, b2)
    jax.block_until_ready(out)

    ref = reference_forward(x, w1_t, b1, w2_t, b2)
    assert out.shape == (B, OUT_DIM)
    assert jnp.allclose(out, ref, atol=2e-5, rtol=2e-5)
    assert jnp.allclose(jnp.sum(out, axis=-1), 1.0, atol=1e-5)

    print("KERNEL_OK")
</pallas_src>

<mosaic_0001>
module attributes {stable_mosaic.version = 11 : i64} {
  func.func @mlp_kernel(%arg0: i32, %arg1: memref<8x784xf32, #tpu.memory_space<vmem>>, %arg2: memref<784x128xf32, #tpu.memory_space<vmem>>, %arg3: memref<1x128xf32, #tpu.memory_space<vmem>>, %arg4: memref<128x128xf32, #tpu.memory_space<vmem>>, %arg5: memref<1x128xf32, #tpu.memory_space<vmem>>, %arg6: memref<8x128xf32, #tpu.memory_space<vmem>>) attributes {dimension_semantics = [#tpu.dimension_semantics<parallel>], iteration_bounds = array<i64: 1>, scalar_prefetch = 0 : i64, scratch_operands = 0 : i64, tpu.core_type = #tpu.core_type<tc>, window_params = [{transform_indices = @transform_0, window_bounds = array<i64: 8, 784>}, {pipeline_mode = #tpu.pipeline_mode<synchronous>, transform_indices = @transform_1, window_bounds = array<i64: 784, 128>}, {pipeline_mode = #tpu.pipeline_mode<synchronous>, transform_indices = @transform_2, window_bounds = array<i64: 1, 128>}, {pipeline_mode = #tpu.pipeline_mode<synchronous>, transform_indices = @transform_3, window_bounds = array<i64: 128, 128>}, {pipeline_mode = #tpu.pipeline_mode<synchronous>, transform_indices = @transform_4, window_bounds = array<i64: 1, 128>}, {transform_indices = @transform_5, window_bounds = array<i64: 8, 128>}]} {
    %c0 = arith.constant 0 : index
    %c0_0 = arith.constant 0 : index
    %0 = vector.load %arg1[%c0, %c0_0] : memref<8x784xf32, #tpu.memory_space<vmem>>, vector<8x784xf32>
    %c0_1 = arith.constant 0 : index
    %c0_2 = arith.constant 0 : index
    %1 = vector.load %arg2[%c0_1, %c0_2] : memref<784x128xf32, #tpu.memory_space<vmem>>, vector<784x128xf32>
    %cst = arith.constant dense<0.000000e+00> : vector<8x128xf32>
    %2 = tpu.matmul %0, %1, %cst {dimension_numbers = #tpu.dot_dimension_numbers<[1], [0], [0], [1], [0, 0, 1, 1], [], []>} : vector<8x784xf32>, vector<784x128xf32>, vector<8x128xf32> -> vector<8x128xf32>
    %c0_3 = arith.constant 0 : index
    %c0_4 = arith.constant 0 : index
    %3 = vector.load %arg3[%c0_3, %c0_4] : memref<1x128xf32, #tpu.memory_space<vmem>>, vector<1x128xf32>
    %4 = vector.broadcast %3 : vector<1x128xf32> to vector<8x128xf32>
    %5 = arith.addf %2, %4 : vector<8x128xf32>
    %cst_5 = arith.constant 0.000000e+00 : f32
    %6 = vector.broadcast %cst_5 : f32 to vector<8x128xf32>
    %7 = arith.maximumf %5, %6 : vector<8x128xf32>
    %c0_6 = arith.constant 0 : index
    %c0_7 = arith.constant 0 : index
    %8 = vector.load %arg4[%c0_6, %c0_7] : memref<128x128xf32, #tpu.memory_space<vmem>>, vector<128x128xf32>
    %cst_8 = arith.constant dense<0.000000e+00> : vector<8x128xf32>
    %9 = tpu.matmul %7, %8, %cst_8 {dimension_numbers = #tpu.dot_dimension_numbers<[1], [0], [0], [1], [0, 0, 1, 1], [], []>} : vector<8x128xf32>, vector<128x128xf32>, vector<8x128xf32> -> vector<8x128xf32>
    %c0_9 = arith.constant 0 : index
    %c0_10 = arith.constant 0 : index
    %10 = vector.load %arg5[%c0_9, %c0_10] : memref<1x128xf32, #tpu.memory_space<vmem>>, vector<1x128xf32>
    %11 = vector.broadcast %10 : vector<1x128xf32> to vector<8x128xf32>
    %12 = arith.addf %9, %11 : vector<8x128xf32>
    %cst_11 = arith.constant dense<0xFF800000> : vector<8xf32>
    %13 = vector.multi_reduction <maximumf>, %12, %cst_11 [1] : vector<8x128xf32> to vector<8xf32>
    %14 = vector.shape_cast %13 : vector<8xf32> to vector<8x1xf32>
    %15 = vector.broadcast %14 : vector<8x1xf32> to vector<8x128xf32>
    %16 = arith.subf %12, %15 : vector<8x128xf32>
    %17 = math.exp %16 : vector<8x128xf32>
    %cst_12 = arith.constant dense<0.000000e+00> : vector<8xf32>
    %18 = vector.multi_reduction <add>, %17, %cst_12 [1] : vector<8x128xf32> to vector<8xf32>
    %19 = vector.shape_cast %18 : vector<8xf32> to vector<8x1xf32>
    %20 = tpu.reciprocal %19 : vector<8x1xf32> -> vector<8x1xf32>
    %21 = vector.broadcast %20 : vector<8x1xf32> to vector<8x128xf32>
    %22 = arith.mulf %17, %21 : vector<8x128xf32>
    %c0_13 = arith.constant 0 : index
    %c0_14 = arith.constant 0 : index
    %23 = vector.load %arg6[%c0_13, %c0_14] : memref<8x128xf32, #tpu.memory_space<vmem>>, vector<8x128xf32>
    tpu.vector_store %arg6[%c0_13, %c0_14], %22 {strides = array<i32>} : memref<8x128xf32, #tpu.memory_space<vmem>>, vector<8x128xf32>,
    return
  }
  func.func @transform_0(%arg0: i32) -> (i32, i32) {
    %c0_i32 = arith.constant 0 : i32
    %c0_i32_0 = arith.constant 0 : i32
    return %arg0, %c0_i32 : i32, i32
  }
  func.func @transform_1(%arg0: i32) -> (i32, i32) {
    %c0_i32 = arith.constant 0 : i32
    %c0_i32_0 = arith.constant 0 : i32
    %c0_i32_1 = arith.constant 0 : i32
    return %c0_i32, %c0_i32_0 : i32, i32
  }
  func.func @transform_2(%arg0: i32) -> (i32, i32) {
    %c0_i32 = arith.constant 0 : i32
    %c0_i32_0 = arith.constant 0 : i32
    %c0_i32_1 = arith.constant 0 : i32
    return %c0_i32, %c0_i32_0 : i32, i32
  }
  func.func @transform_3(%arg0: i32) -> (i32, i32) {
    %c0_i32 = arith.constant 0 : i32
    %c0_i32_0 = arith.constant 0 : i32
    %c0_i32_1 = arith.constant 0 : i32
    return %c0_i32, %c0_i32_0 : i32, i32
  }
  func.func @transform_4(%arg0: i32) -> (i32, i32) {
    %c0_i32 = arith.constant 0 : i32
    %c0_i32_0 = arith.constant 0 : i32
    %c0_i32_1 = arith.constant 0 : i32
    return %c0_i32, %c0_i32_0 : i32, i32
  }
  func.func @transform_5(%arg0: i32) -> (i32, i32) {
    %c0_i32 = arith.constant 0 : i32
    %c0_i32_0 = arith.constant 0 : i32
    return %arg0, %c0_i32 : i32, i32
  }
}

</mosaic_0001>

<bundles_post_ra>
// kernel: tpu_custom_call.1
= control target key start
LH: loop header
LB: loop body
LE: loop exit
PB: predicated region body
PF: predicated region fallthrough
CT: control target
= control target key end

     0   :  { %10 = vsyncpa [#allocation3], 0  ;;  %s1084_s0 = inlined_call_operand.hbm [shape: f32[8,784], index: 0, kind: input, shape index: {}]   ;;  %s1085_s1 = inlined_call_operand.hbm [shape: f32[784,128], index: 1, kind: input, shape index: {}]   ;;  %s1086_s2 = inlined_call_operand.vmem [shape: f32[1,128], index: 2, kind: input, shape index: {}]   ;;  %s1087_s3 = inlined_call_operand.hbm [shape: f32[128,128], index: 3, kind: input, shape index: {}]   ;;  %s1088_s4 = inlined_call_operand.vmem [shape: f32[1,128], index: 4, kind: input, shape index: {}]   ;;  %s1089_s5 = inlined_call_operand.hbm [shape: f32[8,128], index: 5, kind: output, shape index: {}]  }
   0x1   :  { %11 = vsyncpa [#allocation6], 0 }
   0x2   :  { %12 = vsyncpa [#allocation4], 0  ;;  %s976_s18 = smov [#allocation5]   ;;  %s882_s22 = scalar_lea.hbm %s1085_s1, 12544 }
   0x3   :  { %s28_s19 = sshll.u32 %s976_s18, 4  ;;  %p883_p0 = scmp.ne.s32.totalorder %s1085_s1, %s882_s22  ;;  %s29_s19 = int_to_ptr.vmem [resolvable:$true] %s28_s19 }
   0x4   :  { %p886_p1 = scmp.lt.u32.totalorder %s882_s22, %s1085_s1 }
   0x6   :  { %p888_p2 = pnand %p886_p1, %p883_p0 }
   0x8   :  { %891 = shalt.err (!%p888_p2)
}
   0x9   :  { %s892_s27 = scalar_lea.vmem %s29_s19, 12544  ;;  %p897_p4 = scmp.lt.s32.totalorder %s29_s19, %s29_s19 }
   0xa   :  { %p893_p3 = scmp.ne.s32.totalorder %s29_s19, %s892_s27  ;;  %p898_p5 = scmp.lt.s32.totalorder %s892_s27, %s892_s27 }
   0xc   :  { %p899_p6 = por %p898_p5, %p897_p4 }
   0xe   :  { %p900_p7 = pnand %p899_p6, %p893_p3 }
  0x10   :  { %903 = shalt.err (!%p900_p7)
}
  0x11   :  { %s977_s28 = smov 128   ;;  %s978_s29 = smov 8  }
  0x12   :  { %34 = dma.hbm_to_vmem [thread:$0]  %s1085_s1, 12544, %s29_s19, [#allocation6], %s977_s28, %s977_s28, %s978_s29  }
  0x13   :  { %s979_s7 = smov [#allocation2]   ;;  %s980_s9 = smov [#allocation7]  }
  0x14   :  { %s19_s8 = sshll.u32 %s979_s7, 4  ;;  %s42_s10 = sshll.u32 %s980_s9, 4  ;;  %s20_s8 = int_to_ptr.vmem [resolvable:$true] %s19_s8  ;;  %s43_s10 = int_to_ptr.vmem [resolvable:$true] %s42_s10 }
  0x15   :  { %s904_s13 = scalar_lea.hbm %s1084_s0, 896 }
  0x16   :  { %p905_p8 = scmp.ne.s32.totalorder %s1084_s0, %s904_s13  ;;  %p908_p9 = scmp.lt.u32.totalorder %s904_s13, %s1084_s0 }
  0x18   :  { %p910_p10 = pnand %p908_p9, %p905_p8 }
  0x1a   :  { %913 = shalt.err (!%p910_p10)
}
  0x1b   :  { %s914_s1 = scalar_lea.vmem %s20_s8, 896  ;;  %p919_p12 = scmp.lt.s32.totalorder %s20_s8, %s20_s8 }
  0x1c   :  { %p915_p11 = scmp.ne.s32.totalorder %s20_s8, %s914_s1  ;;  %p920_p13 = scmp.lt.s32.totalorder %s914_s1, %s914_s1 }
  0x1e   :  { %p921_p0 = por %p920_p13, %p919_p12 }
  0x20   :  { %p922_p1 = pnand %p921_p0, %p915_p11 }
  0x22   :  { %925 = shalt.err (!%p922_p1)
}
  0x23   :  { %22 = dma.hbm_to_vmem [thread:$0]  %s1084_s0, 896, %s20_s8, [#allocation3]  }
  0x24   :  { %s926_s22 = scalar_lea.hbm %s1087_s3, 2048 }
  0x25   :  { %p927_p2 = scmp.ne.s32.totalorder %s1087_s3, %s926_s22  ;;  %p930_p3 = scmp.lt.u32.totalorder %s926_s22, %s1087_s3 }
  0x27   :  { %p932_p4 = pnand %p930_p3, %p927_p2 }
  0x29   :  { %935 = shalt.err (!%p932_p4)
}
  0x2a   :  { %s936_s27 = scalar_lea.vmem %s43_s10, 2048  ;;  %p941_p6 = scmp.lt.s32.totalorder %s43_s10, %s43_s10 }
  0x2b   :  { %p937_p5 = scmp.ne.s32.totalorder %s43_s10, %s936_s27  ;;  %p942_p7 = scmp.lt.s32.totalorder %s936_s27, %s936_s27 }
  0x2d   :  { %p943_p8 = por %p942_p7, %p941_p6 }
  0x2f   :  { %p944_p9 = pnand %p943_p8, %p937_p5 }
  0x31   :  { %947 = shalt.err (!%p944_p9)
}
  0x32   :  { %48 = dma.hbm_to_vmem [thread:$0]  %s1087_s3, 2048, %s43_s10, [#allocation6], %s977_s28, %s977_s28, %s978_s29  }
  0x33   :  { %970 = dma.done.wait [#allocation3], 896  }
  0x34   :  { %971 = vsyncadd [#allocation3], 4294966400 }
  0x35   :  { %972 = dma.done.wait [#allocation6], 14592  }
  0x36   :  { %973 = vsyncadd [#allocation6], 4294952704  ;;  %v83_v0 = vld [vmem:[#allocation5 + $0x80] sm:$0xff]  ;;  %v84_v1 = vld [vmem:[#allocation5 + $0x88] sm:$0xff]  ;;  %vm982_vm0 = vmmov 0   ;;  %vm172_vm1 = vcmask 130048  }
  0x37   :  { %v67_v2 = vld [vmem:[#allocation5] sm:$0xff]  ;;  %v746_v3 = vpack.c.bf16 %v84_v1, %v83_v0  ;;  %v68_v4 = vld [vmem:[#allocation5 + $0x8] sm:$0xff]  ;;  %v85_v11 = vld [vmem:[#allocation5 + $0x90] sm:$0xff] }
  0x38   :  { %v115_v5 = vld [vmem:[#allocation5 + $0x180] sm:$0xff]  ;;  %v116_v6 = vld [vmem:[#allocation5 + $0x188] sm:$0xff]  ;;  %v748_v7 = vpack.c.bf16 %v68_v4, %v67_v2  ;;  %v86_v13 = vld [vmem:[#allocation5 + $0x98] sm:$0xff] }
  0x39   :  { %v778_v8 = vpack.c.bf16 %v116_v6, %v115_v5  ;;  %v99_v9 = vld [vmem:[#allocation5 + $0x100] sm:$0xff]  ;;  %v100_v10 = vld [vmem:[#allocation5 + $0x108] sm:$0xff]  ;;  %747 = vmatprep.subr.bf16.mxu0 %v746_v3  ;;  %v69_v14 = vld [vmem:[#allocation5 + $0x10] sm:$0xff]  ;;  %v750_v16 = vpack.c.bf16 %v86_v13, %v85_v11 }
  0x3a   :  { %v780_v12 = vpack.c.bf16 %v100_v10, %v99_v9  ;;  %v70_v15 = vld [vmem:[#allocation5 + $0x18] sm:$0xff]  ;;  %749 = vmatpush3.bf16.msra.mxu0 %v748_v7  ;;  %v117_v18 = vld [vmem:[#allocation5 + $0x190] sm:$0xff]  ;;  %v87_v23 = vld [vmem:[#allocation5 + $0xa0] sm:$0xff] }
  0x3b   :  { %779 = vmatprep.subr.bf16.mxu1 %v778_v8  ;;  %v752_v17 = vpack.c.bf16 %v70_v15, %v69_v14  ;;  %v118_v19 = vld [vmem:[#allocation5 + $0x198] sm:$0xff]  ;;  %v101_v20 = vld [vmem:[#allocation5 + $0x110] sm:$0xff]  ;;  %v88_v24 = vld [vmem:[#allocation5 + $0xa8] sm:$0xff]  ;;  %751 = vmatprep.subr.bf16.mxu0 %v750_v16 }
  0x3c   :  { %781 = vmatpush3.bf16.msra.mxu1 %v780_v12  ;;  %v782_v21 = vpack.c.bf16 %v118_v19, %v117_v18  ;;  %v102_v22 = vld [vmem:[#allocation5 + $0x118] sm:$0xff]  ;;  %v754_v26 = vpack.c.bf16 %v88_v24, %v87_v23  ;;  %v71_v27 = vld [vmem:[#allocation5 + $0x20] sm:$0xff]  ;;  %v72_v28 = vld [vmem:[#allocation5 + $0x28] sm:$0xff] }
  0x3d   :  { %v784_v25 = vpack.c.bf16 %v102_v22, %v101_v20  ;;  %v119_v29 = vld [vmem:[#allocation5 + $0x1a0] sm:$0xff]  ;;  %v120_v30 = vld [vmem:[#allocation5 + $0x1a8] sm:$0xff]  ;;  %v756_v33 = vpack.c.bf16 %v72_v28, %v71_v27  ;;  %v89_v35 = vld [vmem:[#allocation5 + $0xb0] sm:$0xff] }
  0x3e   :  { %783 = vmatprep.subr.bf16.mxu1 %v782_v21  ;;  %v103_v31 = vld [vmem:[#allocation5 + $0x120] sm:$0xff]  ;;  %v104_v32 = vld [vmem:[#allocation5 + $0x128] sm:$0xff]  ;;  %753 = vmatpush3.bf16.msra.mxu0 %v752_v17  ;;  %v786_v34 = vpack.c.bf16 %v120_v30, %v119_v29  ;;  %v90_v36 = vld [vmem:[#allocation5 + $0xb8] sm:$0xff] }
  0x3f   :  { %v73_v37 = vld [vmem:[#allocation5 + $0x30] sm:$0xff]  ;;  %755 = vmatprep.subr.bf16.mxu0 %v754_v26  ;;  %v788_v38 = vpack.c.bf16 %v104_v32, %v103_v31  ;;  %v758_v39 = vpack.c.bf16 %v90_v36, %v89_v35  ;;  %v74_v40 = vld [vmem:[#allocation5 + $0x38] sm:$0xff]  ;;  %v91_v46 = vld [vmem:[#allocation5 + $0xc0] sm:$0xff] }
  0x40   :  { %785 = vmatpush3.bf16.msra.mxu1 %v784_v25  ;;  %v121_v41 = vld [vmem:[#allocation5 + $0x1b0] sm:$0xff]  ;;  %v122_v42 = vld [vmem:[#allocation5 + $0x1b8] sm:$0xff]  ;;  %v92_v47 = vld [vmem:[#allocation5 + $0xc8] sm:$0xff]  ;;  %v760_v48 = vpack.c.bf16 %v74_v40, %v73_v37 }
  0x41   :  { %787 = vmatprep.subr.bf16.mxu1 %v786_v34  ;;  %v790_v43 = vpack.c.bf16 %v122_v42, %v121_v41  ;;  %v105_v44 = vld [vmem:[#allocation5 + $0x130] sm:$0xff]  ;;  %v106_v45 = vld [vmem:[#allocation5 + $0x138] sm:$0xff]  ;;  %v123_v49 = vld [vmem:[#allocation5 + $0x1c0] sm:$0xff]  ;;  %v762_v52 = vpack.c.bf16 %v92_v47, %v91_v46 }
  0x42   :  { %757 = vmatpush3.bf16.msra.mxu0 %v756_v33  ;;  %v124_v50 = vld [vmem:[#allocation5 + $0x1c8] sm:$0xff]  ;;  %v792_v51 = vpack.c.bf16 %v106_v45, %v105_v44  ;;  %v75_v53 = vld [vmem:[#allocation5 + $0x40] sm:$0xff]  ;;  %v93_v58 = vld [vmem:[#allocation5 + $0xd0] sm:$0xff] }
  0x43   :  { %759 = vmatprep.subr.bf16.mxu0 %v758_v39  ;;  %v76_v54 = vld [vmem:[#allocation5 + $0x48] sm:$0xff]  ;;  %v107_v55 = vld [vmem:[#allocation5 + $0x140] sm:$0xff]  ;;  %v794_v56 = vpack.c.bf16 %v124_v50, %v123_v49  ;;  %v94_v59 = vld [vmem:[#allocation5 + $0xd8] sm:$0xff]  ;;  %v981_v50 = vmov 0.0|0.0  }
  0x44   :  { %789 = vmatpush3.bf16.msra.mxu1 %v788_v38  ;;  %v108_v57 = vld [vmem:[#allocation5 + $0x148] sm:$0xff]  ;;  %v125_v60 = vld [vmem:[#allocation5 + $0x1d0] sm:$0xff]  ;;  %v126_v61 = vld [vmem:[#allocation5 + $0x1d8] sm:$0xff]  ;;  %v764_v62 = vpack.c.bf16 %v76_v54, %v75_v53  ;;  %v766_v0 = vpack.c.bf16 %v94_v59, %v93_v58 }
  0x45   :  { %791 = vmatprep.subr.bf16.mxu1 %v790_v43  ;;  %v796_v63 = vpack.c.bf16 %v108_v57, %v107_v55  ;;  %v77_v1 = vld [vmem:[#allocation5 + $0x50] sm:$0xff]  ;;  %v78_v2 = vld [vmem:[#allocation5 + $0x58] sm:$0xff]  ;;  %v798_v4 = vpack.c.bf16 %v126_v61, %v125_v60  ;;  %v95_v6 = vld [vmem:[#allocation5 + $0xe0] sm:$0xff]  ;;  %v983_v60 = vmov 0.0  }
  0x46   :  { %761 = vmatpush3.bf16.msra.mxu0 %v760_v48  ;;  %v109_v3 = vld [vmem:[#allocation5 + $0x150] sm:$0xff]  ;;  %v110_v5 = vld [vmem:[#allocation5 + $0x158] sm:$0xff]  ;;  %v96_v7 = vld [vmem:[#allocation5 + $0xe8] sm:$0xff]  ;;  %v768_v10 = vpack.c.bf16 %v78_v2, %v77_v1 }
  0x47   :  { %763 = vmatprep.subr.bf16.mxu0 %v762_v52  ;;  %v127_v8 = vld [vmem:[#allocation5 + $0x1e0] sm:$0xff]  ;;  %v128_v9 = vld [vmem:[#allocation5 + $0x1e8] sm:$0xff]  ;;  %v61_v12 = vld [vmem:[#allocation2 + $0x8] sm:$0xff]  ;;  %v800_v13 = vpack.c.bf16 %v110_v5, %v109_v3  ;;  %v770_v14 = vpack.c.bf16 %v96_v7, %v95_v6 }
  0x48   :  { %793 = vmatpush3.bf16.msra.mxu1 %v792_v51  ;;  %v79_v11 = vld [vmem:[#allocation5 + $0x60] sm:$0xff]  ;;  %v80_v15 = vld [vmem:[#allocation5 + $0x68] sm:$0xff]  ;;  %v802_v18 = vpack.c.bf16 %v128_v9, %v127_v8  ;;  %v97_v19 = vld [vmem:[#allocation5 + $0xf0] sm:$0xff]  ;;  %240 = vmatprep.mubr.f32.mxu0 %v61_v12 }
  0x49   :  { %795 = vmatprep.subr.bf16.mxu1 %v794_v56  ;;  %v111_v16 = vld [vmem:[#allocation5 + $0x160] sm:$0xff]  ;;  %v112_v17 = vld [vmem:[#allocation5 + $0x168] sm:$0xff]  ;;  %v98_v20 = vld [vmem:[#allocation5 + $0xf8] sm:$0xff]  ;;  %v772_v24 = vpack.c.bf16 %v80_v15, %v79_v11 }
  0x4a   :  { %765 = vmatpush3.bf16.msra.mxu0 %v764_v62  ;;  %v63_v21 = vld [vmem:[#allocation2 + $0x18] sm:$0xff]  ;;  %v129_v22 = vld [vmem:[#allocation5 + $0x1f0] sm:$0xff]  ;;  %v130_v23 = vld [vmem:[#allocation5 + $0x1f8] sm:$0xff]  ;;  %v804_v25 = vpack.c.bf16 %v112_v17, %v111_v16  ;;  %v774_v26 = vpack.c.bf16 %v98_v20, %v97_v19 }
  0x4b   :  { %767 = vmatprep.subr.bf16.mxu0 %v766_v0  ;;  %310 = vmatprep.mubr.f32.mxu1 %v63_v21  ;;  %v81_v27 = vld [vmem:[#allocation5 + $0x70] sm:$0xff]  ;;  %v82_v28 = vld [vmem:[#allocation5 + $0x78] sm:$0xff]  ;;  %v806_v30 = vpack.c.bf16 %v130_v23, %v129_v22  ;;  %v147_v32 = vld [vmem:[#allocation5 + $0x280] sm:$0xff] }
  0x4c   :  { %797 = vmatpush3.bf16.msra.mxu1 %v796_v63  ;;  %v113_v29 = vld [vmem:[#allocation5 + $0x170] sm:$0xff]  ;;  %v114_v31 = vld [vmem:[#allocation5 + $0x178] sm:$0xff]  ;;  %v148_v33 = vld [vmem:[#allocation5 + $0x288] sm:$0xff]  ;;  %v776_v34 = vpack.c.bf16 %v82_v28, %v81_v27 }
  0x4d   :  { %799 = vmatprep.subr.bf16.mxu1 %v798_v4  ;;  %v808_v35 = vpack.c.bf16 %v114_v31, %v113_v29  ;;  %v810_v36 = vpack.c.bf16 %v148_v33, %v147_v32  ;;  %v131_v37 = vld [vmem:[#allocation5 + $0x200] sm:$0xff]  ;;  %v132_v38 = vld [vmem:[#allocation5 + $0x208] sm:$0xff]  ;;  %v149_v39 = vld [vmem:[#allocation5 + $0x290] sm:$0xff] }
  0x4e   :  { %769 = vmatpush3.bf16.msra.mxu0 %v768_v10  ;;  %v150_v40 = vld [vmem:[#allocation5 + $0x298] sm:$0xff]  ;;  %v60_v41 = vld [vmem:[#allocation2] sm:$0xff]  ;;  %v812_v42 = vpack.c.bf16 %v132_v38, %v131_v37  ;;  %v133_v44 = vld [vmem:[#allocation5 + $0x210] sm:$0xff] }
  0x4f   :  { %771 = vmatprep.subr.bf16.mxu0 %v770_v14  ;;  %v62_v43 = vld [vmem:[#allocation2 + $0x10] sm:$0xff]  ;;  %v814_v45 = vpack.c.bf16 %v150_v40, %v149_v39  ;;  %v151_v47 = vld [vmem:[#allocation5 + $0x2a0] sm:$0xff]  ;;  %v152_v48 = vld [vmem:[#allocation5 + $0x2a8] sm:$0xff] }
  0x50   :  { %801 = vmatpush3.bf16.msra.mxu1 %v800_v13  ;;  %v134_v46 = vld [vmem:[#allocation5 + $0x218] sm:$0xff]  ;;  %v65_v49 = vld [vmem:[#allocation2 + $0x28] sm:$0xff]  ;;  %v163_v51 = vld [vmem:[#allocation5 + $0x300] sm:$0xff]  ;;  %v818_v55 = vpack.c.bf16 %v152_v48, %v151_v47 }
  0x51   :  { %803 = vmatprep.subr.bf16.mxu1 %v802_v18  ;;  %v164_v52 = vld [vmem:[#allocation5 + $0x308] sm:$0xff]  ;;  %v816_v54 = vpack.c.bf16 %v134_v46, %v133_v44  ;;  %v135_v56 = vld [vmem:[#allocation5 + $0x220] sm:$0xff]  ;;  %v153_v58 = vld [vmem:[#allocation5 + $0x2b0] sm:$0xff] }
  0x52   :  { %773 = vmatpush3.bf16.msra.mxu0 %v772_v24  ;;  %v843_v53 = vpack.c.bf16 %v164_v52, %v163_v51  ;;  %v136_v57 = vld [vmem:[#allocation5 + $0x228] sm:$0xff]  ;;  %v154_v59 = vld [vmem:[#allocation5 + $0x2b8] sm:$0xff]  ;;  %v137_v0 = vld [vmem:[#allocation5 + $0x230] sm:$0xff] }
  0x53   :  { %775 = vmatprep.subr.bf16.mxu0 %v774_v26  ;;  %v66_v61 = vld [vmem:[#allocation2 + $0x30] sm:$0xff]  ;;  %v820_v62 = vpack.c.bf16 %v136_v57, %v135_v56  ;;  %v822_v63 = vpack.c.bf16 %v154_v59, %v153_v58  ;;  %v155_v2 = vld [vmem:[#allocation5 + $0x2c0] sm:$0xff]  ;;  %v156_v3 = vld [vmem:[#allocation5 + $0x2c8] sm:$0xff] }
  0x54   :  { %805 = vmatpush3.bf16.msra.mxu1 %v804_v25  ;;  %v138_v1 = vld [vmem:[#allocation5 + $0x238] sm:$0xff]  ;;  %v826_v5 = vpack.c.bf16 %v156_v3, %v155_v2  ;;  %v139_v6 = vld [vmem:[#allocation5 + $0x240] sm:$0xff]  ;;  %v140_v7 = vld [vmem:[#allocation5 + $0x248] sm:$0xff] }
  0x55   :  { %807 = vmatprep.subr.bf16.mxu1 %v806_v30  ;;  %v824_v4 = vpack.c.bf16 %v138_v1, %v137_v0  ;;  %v157_v8 = vld [vmem:[#allocation5 + $0x2d0] sm:$0xff]  ;;  %v158_v9 = vld [vmem:[#allocation5 + $0x2d8] sm:$0xff]  ;;  %v828_v10 = vpack.c.bf16 %v140_v7, %v139_v6  ;;  %v159_v14 = vld [vmem:[#allocation5 + $0x2e0] sm:$0xff] }
  0x56   :  { %777 = vmatpush3.bf16.msra.mxu0 %v776_v34  ;;  %v830_v11 = vpack.c.bf16 %v158_v9, %v157_v8  ;;  %v141_v12 = vld [vmem:[#allocation5 + $0x250] sm:$0xff]  ;;  %v142_v13 = vld [vmem:[#allocation5 + $0x258] sm:$0xff]  ;;  %v160_v15 = vld [vmem:[#allocation5 + $0x2e8] sm:$0xff] }
  0x57   :  { %811 = vmatprep.subr.bf16.mxu0 %v810_v36  ;;  %v832_v16 = vpack.c.bf16 %v142_v13, %v141_v12  ;;  %v834_v17 = vpack.c.bf16 %v160_v15, %v159_v14  ;;  %v143_v18 = vld [vmem:[#allocation5 + $0x260] sm:$0xff]  ;;  %v144_v19 = vld [vmem:[#allocation5 + $0x268] sm:$0xff]  ;;  %v161_v20 = vld [vmem:[#allocation5 + $0x2f0] sm:$0xff] }
  0x58   :  { %809 = vmatpush3.bf16.msra.mxu1 %v808_v35  ;;  %v162_v21 = vld [vmem:[#allocation5 + $0x2f8] sm:$0xff]  ;;  %v836_v22 = vpack.c.bf16 %v144_v19, %v143_v18  ;;  %v145_v24 = vld [vmem:[#allocation5 + $0x270] sm:$0xff]  ;;  %v64_v27 = vld [vmem:[#allocation2 + $0x20] sm:$0xff] }
  0x59   :  { %842 = vmatprep.subr.bf16.mxu1 %v981_v50  ;;  %241 = vmatmul.mubr.f32.vlgmr.msra.gmra.mrb[0].mxu0 %v60_v41  ;;  %v838_v23 = vpack.c.bf16 %v162_v21, %v161_v20  ;;  %v146_v25 = vld [vmem:[#allocation5 + $0x278] sm:$0xff]  ;;  %v457_v28 = vld [vmem:[#allocation7] sm:$0xff]  ;;  %v459_v30 = vld [vmem:[#allocation7 + $0x10] sm:$0xff] }
  0x5a   :  { %813 = vmatpush3.bf16.msra.mxu0 %v812_v42  ;;  %380 = vmatprep.mubr.f32.mxu0 %v65_v49  ;;  %v840_v26 = vpack.c.bf16 %v146_v25, %v145_v24  ;;  %v458_v29 = vld [vmem:[#allocation7 + $0x8] sm:$0xff]  ;;  %v460_v32 = vld [vmem:[#allocation7 + $0x18] sm:$0xff]  ;;  %v461_v34 = vld [vmem:[#allocation7 + $0x20] sm:$0xff] }
  0x5b   :  { %311 = vmatmul.mubr.f32.vlgmr.msra.gmra.mrb[0].mxu1 %v62_v43  ;;  %815 = vmatprep.subr.bf16.mxu0 %v814_v45  ;;  %v846_v31 = vpack.c.bf16 %v458_v29, %v457_v28  ;;  %v849_v33 = vpack.c.bf16 %v460_v32, %v459_v30  ;;  %v462_v35 = vld [vmem:[#allocation7 + $0x28] sm:$0xff]  ;;  %v463_v37 = vld [vmem:[#allocation7 + $0x30] sm:$0xff]  ;;  %v464_v38 = vld [vmem:[#allocation7 + $0x38] sm:$0xff] }
  0x5c   :  { %844 = vmatpush3.bf16.msra.mxu1 %v843_v53  ;;  %708 = vmatprep.mubr.msk.f32.mxu1 %vm982_vm0, %v983_v60  ;;  %v852_v36 = vpack.c.bf16 %v462_v35, %v461_v34  ;;  %v855_v39 = vpack.c.bf16 %v464_v38, %v463_v37  ;;  %v465_v40 = vld [vmem:[#allocation7 + $0x40] sm:$0xff]  ;;  %v466_v41 = vld [vmem:[#allocation7 + $0x48] sm:$0xff]  ;;  %v467_v43 = vld [vmem:[#allocation7 + $0x50] sm:$0xff] }
  0x5d   :  { %845 = vmatprep.subr.bf16.mxu1 %v981_v50  ;;  %v858_v42 = vpack.c.bf16 %v466_v41, %v465_v40  ;;  %v468_v44 = vld [vmem:[#allocation7 + $0x58] sm:$0xff]  ;;  %v469_v46 = vld [vmem:[#allocation7 + $0x60] sm:$0xff]  ;;  %v470_v47 = vld [vmem:[#allocation7 + $0x68] sm:$0xff] }
  0x5e   :  { %817 = vmatpush3.bf16.msra.mxu0 %v816_v54  ;;  %v861_v45 = vpack.c.bf16 %v468_v44, %v467_v43  ;;  %v864_v48 = vpack.c.bf16 %v470_v47, %v469_v46  ;;  %v471_v49 = vld [vmem:[#allocation7 + $0x70] sm:$0xff]  ;;  %v472_v51 = vld [vmem:[#allocation7 + $0x78] sm:$0xff] }
  0x5f   :  { %819 = vmatprep.subr.bf16.mxu0 %v818_v55  ;;  %709 = vmatmul.mubr.msk.f32.vlgmr.msra.gmra.mrb[2].mxu1 %vm172_vm1, %v66_v61  ;;  %v867_v52 = vpack.c.bf16 %v472_v51, %v471_v49  ;;  %v576_v54 = vld [vmem:[%s1086_s2] ss:$0 sm:$0xff]  ;;  %s984_s2 = smov [#allocation8]  }
  0x60   :  { %743 = vmatprep.mubr.msk.f32.mxu1 %vm982_vm0, %v983_v60  ;;  %847 = vmatpush3.bf16.msra.mxu1 %v846_v31  ;;  %s566_s7 = sshll.u32 %s984_s2, 4  ;;  %s567_s7 = int_to_ptr.vmem [resolvable:$true] %s566_s7 }
  0x61   :  { %848 = vmatprep.subr.bf16.mxu1 %v981_v50  ;;  %s948_s8 = scalar_lea.vmem %s567_s7, 128  ;;  %p953_p11 = scmp.lt.s32.totalorder %s567_s7, %s567_s7 }
  0x62   :  { %821 = vmatpush3.bf16.msra.mxu0 %v820_v62  ;;  %p949_p10 = scmp.ne.s32.totalorder %s567_s7, %s948_s8  ;;  %p954_p12 = scmp.lt.s32.totalorder %s948_s8, %s948_s8 }
  0x63   :  { %823 = vmatprep.subr.bf16.mxu0 %v822_v63 }
  0x64   :  { %850 = vmatpush3.bf16.msra.mxu1 %v849_v33  ;;  %p955_p13 = por %p954_p12, %p953_p11 }
  0x65   :  { %851 = vmatprep.subr.bf16.mxu1 %v981_v50 }
  0x66   :  { %825 = vmatpush3.bf16.msra.mxu0 %v824_v4  ;;  %p956_p0 = pnand %p955_p13, %p949_p10 }
  0x67   :  { %827 = vmatprep.subr.bf16.mxu0 %v826_v5  ;;  %v578_v5 = vld [vmem:[%s1088_s4] ss:$0 sm:$0xff] }
  0x68   :  { %853 = vmatpush3.bf16.msra.mxu1 %v852_v36 }
  0x69   :  { %854 = vmatprep.subr.bf16.mxu1 %v981_v50 }
  0x6a   :  { %829 = vmatpush3.bf16.msra.mxu0 %v828_v10 }
  0x6b   :  { %831 = vmatprep.subr.bf16.mxu0 %v830_v11 }
  0x6c   :  { %856 = vmatpush3.bf16.msra.mxu1 %v855_v39 }
  0x6d   :  { %857 = vmatprep.subr.bf16.mxu1 %v981_v50 }
  0x6e   :  { %833 = vmatpush3.bf16.msra.mxu0 %v832_v16 }
  0x6f   :  { %835 = vmatprep.subr.bf16.mxu0 %v834_v17 }
  0x70   :  { %859 = vmatpush3.bf16.msra.mxu1 %v858_v42 }
  0x71   :  { %860 = vmatprep.subr.bf16.mxu1 %v981_v50 }
  0x72   :  { %837 = vmatpush3.bf16.msra.mxu0 %v836_v22 }
  0x73   :  { %839 = vmatprep.subr.bf16.mxu0 %v838_v23 }
  0x74   :  { %862 = vmatpush3.bf16.msra.mxu1 %v861_v45 }
  0x75   :  { %863 = vmatprep.subr.bf16.mxu1 %v981_v50 }
  0x76   :  { %841 = vmatpush3.bf16.msra.mxu0 %v840_v26 }
  0x78   :  { %865 = vmatpush3.bf16.msra.mxu1 %v864_v48 }
  0x79   :  { %381 = vmatmul.mubr.f32.vlgmr.msra.gmra.mrb[2].mxu0 %v64_v27  ;;  %866 = vmatprep.subr.bf16.mxu1 %v981_v50 }
  0x7c   :  { %868 = vmatpush3.bf16.msra.mxu1 %v867_v52 }
 0x12c   :  { %v611_v53 = vpop.f32.mrb[0].mxu0 }
 0x12d   :  { %v612_v55 = vpop.f32.mrb[1].mxu0 }
 0x12e   :  { %v646_v56 = vpop.f32.mrb[0].mxu1  ;;  %v613_v57 = vadd.f32 %v612_v55, %v611_v53 }
 0x12f   :  { %v647_v58 = vpop.f32.mrb[1].mxu1 }
 0x130   :  { %v648_v59 = vadd.f32 %v647_v58, %v646_v56  ;;  %v243_v60 = vadd.f32 %v613_v57, %v576_v54 }
 0x132   :  { %v313_v61 = vadd.f32 %v648_v59, %v243_v60  ;;  %v452_v62 = vpop.f32.mrb[2].mxu1 }
 0x133   :  { %v710_v63 = vpop.f32.mrb[3].mxu1 }
 0x14c   :  { %v681_v0 = vpop.f32.mrb[2].mxu0 }
 0x14d   :  { %v682_v50 = vpop.f32.mrb[3].mxu0 }
 0x14e   :  { %v683_v1 = vadd.f32 %v682_v50, %v681_v0 }
 0x150   :  { %v383_v2 = vadd.f32 %v683_v1, %v313_v61 }
 0x152   :  { %v453_v3 = vadd.f32 %v452_v62, %v383_v2 }
 0x154   :  { %v456_v4 = vmax.f32 %v453_v3, 0.0 }
 0x156   :  { %744 = vmatmul.mubr.f32.vlgmr.msra.gmra.mrb[4].mxu1 %v456_v4 }
 0x229   :  { %v546_v6 = vpop.f32.mrb[4].mxu1 }
 0x22a   :  { %v547_v7 = vadd.f32 %v578_v5, %v546_v6  ;;  %v745_v8 = vpop.f32.mrb[5].mxu1 }
 0x22c   :  { %550 = vmax.xlane.f32.xlu0 %v547_v7 }
 0x2b9   :  { %v551_v9 = vpop.xlane.xlu0 %550 }
 0x2ba   :  { %v552_v10 = vsub.f32 %v547_v7, %v551_v9 }
 0x2bc   :  { %v553_v11 = vmul.f32 1.442695, %v552_v10 }
 0x2be   :  { %878 = vpow2.f32 %v553_v11 }
 0x2c8   :  { %v879_v12 = vpop.eup %878 }
 0x2c9   :  { %555 = vadd.xlane.f32.xlu0 %v879_v12 }
 0x356   :  { %v556_v13 = vpop.xlane.xlu0 %555 }
 0x357   :  { %880 = vrcp.f32 %v556_v13 }
 0x361   :  { %v881_v14 = vpop.eup %880 }
 0x362   :  { %v558_v15 = vmul.f32 %v881_v14, %v879_v12 }
 0x364   :  { %559 = vst [vmem:[#allocation8] sm:$0xff] %v558_v15 }
 0x365   :  { %959 = shalt.err (!%p956_p0)
}
 0x366   :  { %s960_s10 = scalar_lea.hbm %s1089_s5, 128 }
 0x367   :  { %p961_p1 = scmp.ne.s32.totalorder %s1089_s5, %s960_s10  ;;  %p964_p2 = scmp.lt.u32.totalorder %s960_s10, %s1089_s5 }
 0x369   :  { %p966_p3 = pnand %p964_p2, %p961_p1 }
 0x36b   :  { %969 = shalt.err (!%p966_p3)
}
 0x36c   :  { %569 = dma.vmem_to_hbm [thread:$0]  %s567_s7, 128, %s1089_s5, [#allocation4]  }
 0x36d   :  { %974 = dma.done.wait [#allocation4], 128  }
 0x36e   :  { %975 = vsyncadd [#allocation4], 4294967168 }
 0x36f   :  { %573 = vsyncpa [#allocation3], 1 }
 0x370   :  { %574 = vsyncpa [#allocation6], 1 }
 0x371   :  { %575 = vsyncpa [#allocation4], 1 }

</bundles_post_ra>
